<compile_context>
chip_gen: v5e
topology: v5e:2x2
jax: 0.10.0
libtpu: 0.0.40
codegen_flags: <defaults>
</compile_context>

<pallas_src>
import functools

import numpy as np
import jax
import jax.numpy as jnp
from jax import lax
from jax.experimental import pallas as pl
from jax.experimental.pallas import tpu as pltpu

STRIDE = 8        # encoder output stride stand-in
FEAT_C = 256      # channels feeding classifier[4] (matches DeepLabHead)
LANE = 128
TM_TARGET = 512   # position-tile rows (M dim of the stem / K dim of the FC dot)


def _round_up(x, m):
    return (x + m - 1) // m * m


# ----------------------------------------------------------------------------
# Static tiling plan shared by fold_params() and the forward wrapper.
# ----------------------------------------------------------------------------
def _plan(img_size, num_pts, out_dim):
    H, W = img_size
    Hp, Wp = H // STRIDE, W // STRIDE
    Mtot = Hp * Wp
    N = num_pts * out_dim
    # Lane-dense padded FC width; when wide enough, pad to a multiple of 256 and
    # split into 2 column chunks -> a "parallel" grid axis for v7x's 2 TCs.
    Npad = _round_up(max(N, LANE), LANE)
    if Npad >= 4 * LANE:
        Npad = _round_up(Npad, 2 * LANE)
        n_col = 2
    else:
        n_col = 1
    Nc = Npad // n_col
    # Position tile: ~TM_TARGET rows, never the whole (unbounded) position axis;
    # the tail is zero-padded instead.
    tm = min(TM_TARGET, _round_up(Mtot, 8))
    Mtot_pad = _round_up(Mtot, tm)
    n_m = Mtot_pad // tm
    return dict(H=H, W=W, Hp=Hp, Wp=Wp, Mtot=Mtot, Mtot_pad=Mtot_pad,
                N=N, Npad=Npad, Nc=Nc, n_col=n_col, tm=tm, n_m=n_m)


# ----------------------------------------------------------------------------
# Bilinear (align_corners=False, half-pixel) interpolation matrix.
# ----------------------------------------------------------------------------
def bilinear_matrix(in_size, out_size):
    scale = in_size / out_size
    i = np.arange(out_size, dtype=np.float64)
    src = np.maximum((i + 0.5) * scale - 0.5, 0.0)
    i0 = np.minimum(np.floor(src).astype(np.int64), in_size - 1)
    i1 = np.minimum(i0 + 1, in_size - 1)
    w1 = src - i0
    w0 = 1.0 - w1
    M = np.zeros((out_size, in_size), dtype=np.float32)
    M[np.arange(out_size), i0] += w0
    M[np.arange(out_size), i1] += w1
    # Every interpolation row sums to 1; the cls-bias fold in fold_params()
    # depends on this invariant (half-pixel bilinear with clamped edges).
    assert np.allclose(M.sum(axis=1), 1.0, atol=1e-6)
    return jnp.asarray(M)  # (out_size, in_size)


# ----------------------------------------------------------------------------
# "Module-like" parameters (unfused, f32) + one-time algebraic folding.
# ----------------------------------------------------------------------------
def init_params(key, img_size, num_pts, out_dim):
    H, W = img_size
    k1, k2, k3, k4, k5 = jax.random.split(key, 5)
    stem_in = 3 * STRIDE * STRIDE
    feat_dim = H * W                      # out_map is (B,1,H,W) -> C*Hp*Wp = H*W
    return {
        "stem_w": 0.05 * jax.random.normal(k1, (stem_in, FEAT_C), jnp.float32),
        "stem_b": 0.01 * jax.random.normal(k5, (FEAT_C,), jnp.float32),
        "cls_w":  0.05 * jax.random.normal(k2, (FEAT_C, 1), jnp.float32),
        "cls_b":  jnp.array([0.02], jnp.float32),
        "fc_w":   0.02 * jax.random.normal(k3, (feat_dim, num_pts * out_dim), jnp.float32),
        "fc_b":   0.01 * jax.random.normal(k4, (num_pts * out_dim,), jnp.float32),
    }


def fold_params(params, img_size, num_pts, out_dim):
    """One-time algebraic folds (all stages are linear except the single ReLU)."""
    plan = _plan(img_size, num_pts, out_dim)
    H, W, Hp, Wp = plan["H"], plan["W"], plan["Hp"], plan["Wp"]
    Mtot, Mtot_pad, N, Npad = plan["Mtot"], plan["Mtot_pad"], plan["N"], plan["Npad"]

    # (a) three identical input channels -> sum the three 64-row blocks of stem_w
    sw = params["stem_w"]
    s2 = STRIDE * STRIDE
    sw_eff = sw[0:s2] + sw[s2:2 * s2] + sw[2 * s2:3 * s2]          # (64, 256)

    # (b) fold bilinear upsample (separable Mh, Mw) + flatten into the FC weight
    Mh = bilinear_matrix(Hp, H)                                    # (H, Hp)
    Mw = bilinear_matrix(Wp, W)                                    # (W, Wp)
    fcw3 = params["fc_w"].reshape(H, W, N)
    tmp = jnp.einsum("hp,hwn->pwn", Mh, fcw3)                      # (Hp, W, N)
    fcw_eff = jnp.einsum("wq,pwn->pqn", Mw, tmp).reshape(Mtot, N)

    # (c) fold the classifier bias through the linear FC (valid since bilinear
    #     rows sum to 1): + cls_b * sum_p fcw_eff[p, :]
    fb_eff = params["fc_b"] + params["cls_b"][0] * fcw_eff.sum(axis=0)

    # (d) pad FC output dim to a lane-dense multiple of 128 (256 when split) and
    #     pad rows to Mtot_pad with ZEROS (kills contributions of padded rows).
    fw_pad = jnp.zeros((Mtot_pad, Npad), jnp.float32).at[:Mtot, :N].set(fcw_eff)
    fb_pad = jnp.zeros((1, Npad), jnp.float32).at[:, :N].set(fb_eff)

    return {
        "stem_w": sw_eff.astype(jnp.bfloat16),                     # (64, 256)
        "stem_b": params["stem_b"].reshape(1, FEAT_C).astype(jnp.float32),
        "cls_w":  params["cls_w"].reshape(1, FEAT_C).astype(jnp.float32),
        "fc_w":   fw_pad.astype(jnp.bfloat16),                     # (Mtot_pad, Npad)
        "fc_b":   fb_pad,                                          # (1, Npad) f32
    }


# ----------------------------------------------------------------------------
# Fused Pallas kernel: stem matmul + bias + ReLU -> 1x1 classifier (VPU) ->
# batched FC (upsample folded) accumulated into a resident (B, Nc) f32 block.
# Grid: (n_col, n_m); axis 0 "parallel" (column chunks), axis 1 "arbitrary"
# (position-tile reduction, output block resident across it).
# ----------------------------------------------------------------------------
def _make_kernel(B, tm):
    def kernel(patch_ref, sw_ref, sb_ref, cw_ref, fw_ref, fb_ref, out_ref):
        m = pl.program_id(1)

        @pl.when(m == 0)
        def _init():
            out_ref[...] = jnp.broadcast_to(fb_ref[...], out_ref.shape)

        kp = patch_ref.shape[-1]

        # stem "conv" on the MXU: (B*tm, 64) bf16 @ (64, 256) bf16 -> f32
        x = patch_ref[...].reshape(B * tm, kp)        # collapse leading dims (free)
        feat = jnp.dot(x, sw_ref[...], preferred_element_type=jnp.float32)
        feat = jnp.maximum(feat + sb_ref[...], 0.0)   # (B*tm, 256) f32, VPU

        # classifier[4] Conv2d(256,1,1): VPU multiply + lane reduce (keeps the MXU
        # free and avoids the lane-sparse (.,1) matmul result).
        logit = jnp.sum(feat * cw_ref[...], axis=-1, keepdims=True)   # (B*tm, 1) f32

        # Regroup per-batch logits into a lane-dense (tm, B) matrix using
        # iota/select (no concat / relayout-heavy reshape needed).
        col = lax.broadcasted_iota(jnp.int32, (tm, B), 1)
        L = jnp.zeros((tm, B), jnp.float32)
        for b in range(B):
            L = L + jnp.where(col == b, logit[b * tm:(b + 1) * tm, :], 0.0)

        # Batched FC (bilinear upsample folded into fw): one (tm,B)^T @ (tm,Nc)
        # MXU dot per grid step, f32 accumulation into the resident output block.
        # (For tighter tolerances: keep L f32 and cast fw_ref to f32 here.)
        contrib = lax.dot_general(
            L.astype(jnp.bfloat16), fw_ref[...],
            dimension_numbers=(((0,), (0,)), ((), ())),
            preferred_element_type=jnp.float32)                       # (B, Nc)
        out_ref[...] += contrib

    return kernel


def _fused_call(patches, sw, sb, cw, fw, fb, *, plan):
    B, Mtot_pad, Kp = patches.shape
    C = sw.shape[1]
    tm, n_m, n_col, Nc, Npad = (plan["tm"], plan["n_m"], plan["n_col"],
                                plan["Nc"], plan["Npad"])
    assert Mtot_pad == plan["Mtot_pad"]
    assert fw.shape == (Mtot_pad, Npad) and fb.shape == (1, Npad)

    nbytes = lambda a: a.size * a.dtype.itemsize
    cost = pl.CostEstimate(
        flops=int(2 * B * Mtot_pad * (Kp * C + C + Npad)),
        transcendentals=0,
        bytes_accessed=int(n_col * nbytes(patches) + nbytes(fw) + nbytes(sw)
                           + nbytes(sb) + nbytes(cw) + nbytes(fb) + B * Npad * 4))

    # VMEM budget: double-buffered streamed operands + resident constants +
    # the (B, Nc) accumulator; clamped to <= 48 MiB so it is v7x (64 MiB) safe.
    # (Constant-index blocks are tiny here, so we skip pipeline_mode tweaks.)
    vmem_need = (2 * B * tm * Kp * 2 + 2 * tm * Nc * 2 + 2 * B * Nc * 4
                 + Kp * C * 2 + 2 * C * 4 + Nc * 4)
    vmem_limit = int(min(max(2 * vmem_need + (4 << 20), 32 << 20), 48 << 20))

    out = pl.pallas_call(
        _make_kernel(B, tm),
        out_shape=jax.ShapeDtypeStruct((B, Npad), jnp.float32),
        grid=(n_col, n_m),
        in_specs=[
            pl.BlockSpec((B, tm, Kp), lambda c, m: (0, m, 0)),   # patches tile
            pl.BlockSpec((Kp, C),     lambda c, m: (0, 0)),      # stem_w (const)
            pl.BlockSpec((1, C),      lambda c, m: (0, 0)),      # stem_b (const)
            pl.BlockSpec((1, C),      lambda c, m: (0, 0)),      # cls_w  (const)
            pl.BlockSpec((tm, Nc),    lambda c, m: (m, c)),      # folded fc_w tile
            pl.BlockSpec((1, Nc),     lambda c, m: (0, c)),      # folded fc_b
        ],
        out_specs=pl.BlockSpec((B, Nc), lambda c, m: (0, c)),
        compiler_params=pltpu.CompilerParams(
            dimension_semantics=("parallel", "arbitrary"),
            vmem_limit_bytes=vmem_limit),
        cost_estimate=cost,
    )(patches, sw, sb, cw, fw, fb)
    return out                                                    # (B, Npad) f32


# ----------------------------------------------------------------------------
# Forward
# ----------------------------------------------------------------------------
def mask2points_forward(mask, fparams, *, num_pts, out_dim):
    """mask: (B, 1, H, W) float32 (binary). Returns (pts,), pts: (B, num_pts, out_dim)."""
    B, _, H, W = mask.shape
    plan = _plan((H, W), num_pts, out_dim)
    Hp, Wp, Mtot, Mtot_pad = plan["Hp"], plan["Wp"], plan["Mtot"], plan["Mtot_pad"]

    # single-channel im2col (3-channel broadcast folded into stem_w);
    # mask is binary so the bf16 cast is exact.
    patches = (mask.reshape(B, Hp, STRIDE, Wp, STRIDE)
                   .transpose(0, 1, 3, 2, 4)
                   .reshape(B, Mtot, STRIDE * STRIDE)
                   .astype(jnp.bfloat16))
    if Mtot_pad != Mtot:
        patches = jnp.pad(patches, ((0, 0), (0, Mtot_pad - Mtot), (0, 0)))

    coords_pad = _fused_call(patches, fparams["stem_w"], fparams["stem_b"],
                             fparams["cls_w"], fparams["fc_w"], fparams["fc_b"],
                             plan=plan)                               # (B, Npad)
    pts = coords_pad[:, :num_pts * out_dim].reshape(B, num_pts, out_dim)
    return (pts,)


# ----------------------------------------------------------------------------
# Pure-JAX f32 reference of the UNFOLDED pipeline (validates all algebraic folds).
# ----------------------------------------------------------------------------
def reference_forward(mask, params, *, num_pts, out_dim):
    B, _, H, W = mask.shape
    Hp, Wp = H // STRIDE, W // STRIDE
    x = jnp.broadcast_to(mask, (B, 3, H, W))
    patches = (x.reshape(B, 3, Hp, STRIDE, Wp, STRIDE)
                .transpose(0, 2, 4, 1, 3, 5)
                .reshape(B * Hp * Wp, 3 * STRIDE * STRIDE))
    feat = jnp.maximum(patches @ params["stem_w"] + params["stem_b"], 0.0)
    logits = feat @ params["cls_w"] + params["cls_b"]
    low = logits.reshape(B, Hp, Wp)
    Mh = bilinear_matrix(Hp, H)    # (H, Hp)
    Mw = bilinear_matrix(Wp, W)    # (W, Wp)
    up = jnp.einsum("hp,bpq,wq->bhw", Mh, low, Mw)
    coords = up.reshape(B, H * W) @ params["fc_w"] + params["fc_b"]
    return coords.reshape(B, num_pts, out_dim)


if __name__ == "__main__":
    B = 2
    H = W = 32
    NUM_PTS = 8
    OUT_DIM = 3

    key = jax.random.PRNGKey(0)
    k_param, k_mask = jax.random.split(key)

    params = init_params(k_param, (H, W), NUM_PTS, OUT_DIM)
    fparams = fold_params(params, (H, W), NUM_PTS, OUT_DIM)   # one-time folds
    mask = (jax.random.uniform(k_mask, (B, 1, H, W)) > 0.5).astype(jnp.float32)

    fwd = jax.jit(functools.partial(mask2points_forward, num_pts=NUM_PTS, out_dim=OUT_DIM))
    (pts,) = fwd(mask, fparams)
    pts = jax.block_until_ready(pts)

    assert pts.shape == (B, NUM_PTS, OUT_DIM), pts.shape
    assert pts.dtype == jnp.float32
    assert bool(jnp.all(jnp.isfinite(pts)))

    ref = reference_forward(mask, params, num_pts=NUM_PTS, out_dim=OUT_DIM)
    np.testing.assert_allclose(np.asarray(pts), np.asarray(ref), rtol=5e-2, atol=5e-2)

    print("KERNEL_OK")
</pallas_src>

<mosaic_0001>
module attributes {stable_mosaic.version = 11 : i64} {
  func.func @kernel(%arg0: i32, %arg1: i32, %arg2: memref<2x16x64xbf16, #tpu.memory_space<vmem>>, %arg3: memref<64x256xbf16, #tpu.memory_space<vmem>>, %arg4: memref<1x256xf32, #tpu.memory_space<vmem>>, %arg5: memref<1x256xf32, #tpu.memory_space<vmem>>, %arg6: memref<16x128xbf16, #tpu.memory_space<vmem>>, %arg7: memref<1x128xf32, #tpu.memory_space<vmem>>, %arg8: memref<2x128xf32, #tpu.memory_space<vmem>>) attributes {dimension_semantics = [#tpu.dimension_semantics<parallel>, #tpu.dimension_semantics<arbitrary>], iteration_bounds = array<i64: 1, 1>, scalar_prefetch = 0 : i64, scratch_operands = 0 : i64, tpu.core_type = #tpu.core_type<tc>, window_params = [{transform_indices = @transform_0, window_bounds = array<i64: 2, 16, 64>}, {pipeline_mode = #tpu.pipeline_mode<synchronous>, transform_indices = @transform_1, window_bounds = array<i64: 64, 256>}, {pipeline_mode = #tpu.pipeline_mode<synchronous>, transform_indices = @transform_2, window_bounds = array<i64: 1, 256>}, {pipeline_mode = #tpu.pipeline_mode<synchronous>, transform_indices = @transform_3, window_bounds = array<i64: 1, 256>}, {transform_indices = @transform_4, window_bounds = array<i64: 16, 128>}, {transform_indices = @transform_5, window_bounds = array<i64: 1, 128>}, {transform_indices = @transform_6, window_bounds = array<i64: 2, 128>}]} {
    %c0_i32 = arith.constant 0 : i32
    %0 = arith.cmpi eq, %arg1, %c0_i32 : i32
    %1 = arith.extui %0 : i1 to i32
    %c0_i32_0 = arith.constant 0 : i32
    %2 = arith.cmpi ne, %1, %c0_i32_0 : i32
    scf.if %2 {
      %c0_22 = arith.constant 0 : index
      %c0_23 = arith.constant 0 : index
      %41 = vector.load %arg7[%c0_22, %c0_23] : memref<1x128xf32, #tpu.memory_space<vmem>>, vector<1x128xf32>
      %42 = vector.shape_cast %41 : vector<1x128xf32> to vector<1x128xf32>
      %43 = vector.broadcast %42 : vector<1x128xf32> to vector<2x128xf32>
      %c0_24 = arith.constant 0 : index
      %c0_25 = arith.constant 0 : index
      %44 = vector.load %arg8[%c0_24, %c0_25] : memref<2x128xf32, #tpu.memory_space<vmem>>, vector<2x128xf32>
      tpu.vector_store %arg8[%c0_24, %c0_25], %43 {strides = array<i32>} : memref<2x128xf32, #tpu.memory_space<vmem>>, vector<2x128xf32>,
    } else {
    }
    %c0 = arith.constant 0 : index
    %c0_1 = arith.constant 0 : index
    %c0_2 = arith.constant 0 : index
    %3 = vector.load %arg2[%c0, %c0_1, %c0_2] : memref<2x16x64xbf16, #tpu.memory_space<vmem>>, vector<2x16x64xbf16>
    %4 = vector.shape_cast %3 : vector<2x16x64xbf16> to vector<32x64xbf16>
    %c0_3 = arith.constant 0 : index
    %c0_4 = arith.constant 0 : index
    %5 = vector.load %arg3[%c0_3, %c0_4] : memref<64x256xbf16, #tpu.memory_space<vmem>>, vector<64x256xbf16>
    %cst = arith.constant dense<0.000000e+00> : vector<32x256xf32>
    %6 = tpu.matmul %4, %5, %cst {dimension_numbers = #tpu.dot_dimension_numbers<[1], [0], [0], [1], [0, 0, 1, 1], [], []>} : vector<32x64xbf16>, vector<64x256xbf16>, vector<32x256xf32> -> vector<32x256xf32>
    %c0_5 = arith.constant 0 : index
    %c0_6 = arith.constant 0 : index
    %7 = vector.load %arg4[%c0_5, %c0_6] : memref<1x256xf32, #tpu.memory_space<vmem>>, vector<1x256xf32>
    %8 = vector.broadcast %7 : vector<1x256xf32> to vector<32x256xf32>
    %9 = arith.addf %6, %8 : vector<32x256xf32>
    %cst_7 = arith.constant 0.000000e+00 : f32
    %10 = vector.broadcast %cst_7 : f32 to vector<32x256xf32>
    %11 = arith.maximumf %9, %10 : vector<32x256xf32>
    %c0_8 = arith.constant 0 : index
    %c0_9 = arith.constant 0 : index
    %12 = vector.load %arg5[%c0_8, %c0_9] : memref<1x256xf32, #tpu.memory_space<vmem>>, vector<1x256xf32>
    %13 = vector.broadcast %12 : vector<1x256xf32> to vector<32x256xf32>
    %14 = arith.mulf %11, %13 : vector<32x256xf32>
    %cst_10 = arith.constant dense<0.000000e+00> : vector<32xf32>
    %15 = vector.multi_reduction <add>, %14, %cst_10 [1] : vector<32x256xf32> to vector<32xf32>
    %16 = vector.shape_cast %15 : vector<32xf32> to vector<32x1xf32>
    %17 = tpu.iota {dimensions = array<i32: 1>} : vector<16x2xi32>
    %cst_11 = arith.constant 0.000000e+00 : f32
    %18 = vector.broadcast %cst_11 : f32 to vector<16x2xf32>
    %c0_i32_12 = arith.constant 0 : i32
    %19 = vector.broadcast %c0_i32_12 : i32 to vector<16x2xi32>
    %20 = arith.cmpi eq, %17, %19 : vector<16x2xi32>
    %21 = vector.extract_strided_slice %16 {offsets = [0, 0], sizes = [16, 1], strides = [1, 1]} : vector<32x1xf32> to vector<16x1xf32>
    %cst_13 = arith.constant 0.000000e+00 : f32
    %22 = vector.shape_cast %21 : vector<16x1xf32> to vector<16x1xf32>
    %23 = vector.broadcast %22 : vector<16x1xf32> to vector<16x2xf32>
    %24 = vector.broadcast %cst_13 : f32 to vector<16x2xf32>
    %25 = arith.select %20, %23, %24 : vector<16x2xi1>, vector<16x2xf32>
    %26 = arith.addf %18, %25 : vector<16x2xf32>
    %c1_i32 = arith.constant 1 : i32
    %27 = vector.broadcast %c1_i32 : i32 to vector<16x2xi32>
    %28 = arith.cmpi eq, %17, %27 : vector<16x2xi32>
    %29 = vector.extract_strided_slice %16 {offsets = [16, 0], sizes = [16, 1], strides = [1, 1]} : vector<32x1xf32> to vector<16x1xf32>
    %cst_14 = arith.constant 0.000000e+00 : f32
    %30 = vector.shape_cast %29 : vector<16x1xf32> to vector<16x1xf32>
    %31 = vector.broadcast %30 : vector<16x1xf32> to vector<16x2xf32>
    %32 = vector.broadcast %cst_14 : f32 to vector<16x2xf32>
    %33 = arith.select %28, %31, %32 : vector<16x2xi1>, vector<16x2xf32>
    %34 = arith.addf %26, %33 : vector<16x2xf32>
    %35 = arith.truncf %34 : vector<16x2xf32> to vector<16x2xbf16>
    %c0_15 = arith.constant 0 : index
    %c0_16 = arith.constant 0 : index
    %36 = vector.load %arg6[%c0_15, %c0_16] : memref<16x128xbf16, #tpu.memory_space<vmem>>, vector<16x128xbf16>
    %cst_17 = arith.constant dense<0.000000e+00> : vector<2x128xf32>
    %37 = tpu.matmul %35, %36, %cst_17 {dimension_numbers = #tpu.dot_dimension_numbers<[0], [0], [1], [1], [0, 1, 1, 1], [], []>} : vector<16x2xbf16>, vector<16x128xbf16>, vector<2x128xf32> -> vector<2x128xf32>
    %c0_18 = arith.constant 0 : index
    %c0_19 = arith.constant 0 : index
    %38 = vector.load %arg8[%c0_18, %c0_19] : memref<2x128xf32, #tpu.memory_space<vmem>>, vector<2x128xf32>
    %39 = arith.addf %38, %37 : vector<2x128xf32>
    %c0_20 = arith.constant 0 : index
    %c0_21 = arith.constant 0 : index
    %40 = vector.load %arg8[%c0_20, %c0_21] : memref<2x128xf32, #tpu.memory_space<vmem>>, vector<2x128xf32>
    tpu.vector_store %arg8[%c0_20, %c0_21], %39 {strides = array<i32>} : memref<2x128xf32, #tpu.memory_space<vmem>>, vector<2x128xf32>,
    return
  }
  func.func @transform_0(%arg0: i32, %arg1: i32) -> (i32, i32, i32) {
    %c0_i32 = arith.constant 0 : i32
    %c0_i32_0 = arith.constant 0 : i32
    %c0_i32_1 = arith.constant 0 : i32
    return %c0_i32, %arg1, %c0_i32_0 : i32, i32, i32
  }
  func.func @transform_1(%arg0: i32, %arg1: i32) -> (i32, i32) {
    %c0_i32 = arith.constant 0 : i32
    %c0_i32_0 = arith.constant 0 : i32
    %c0_i32_1 = arith.constant 0 : i32
    return %c0_i32, %c0_i32_0 : i32, i32
  }
  func.func @transform_2(%arg0: i32, %arg1: i32) -> (i32, i32) {
    %c0_i32 = arith.constant 0 : i32
    %c0_i32_0 = arith.constant 0 : i32
    %c0_i32_1 = arith.constant 0 : i32
    return %c0_i32, %c0_i32_0 : i32, i32
  }
  func.func @transform_3(%arg0: i32, %arg1: i32) -> (i32, i32) {
    %c0_i32 = arith.constant 0 : i32
    %c0_i32_0 = arith.constant 0 : i32
    %c0_i32_1 = arith.constant 0 : i32
    return %c0_i32, %c0_i32_0 : i32, i32
  }
  func.func @transform_4(%arg0: i32, %arg1: i32) -> (i32, i32) {
    %c0_i32 = arith.constant 0 : i32
    return %arg1, %arg0 : i32, i32
  }
  func.func @transform_5(%arg0: i32, %arg1: i32) -> (i32, i32) {
    %c0_i32 = arith.constant 0 : i32
    %c0_i32_0 = arith.constant 0 : i32
    return %c0_i32, %arg0 : i32, i32
  }
  func.func @transform_6(%arg0: i32, %arg1: i32) -> (i32, i32) {
    %c0_i32 = arith.constant 0 : i32
    %c0_i32_0 = arith.constant 0 : i32
    return %c0_i32, %arg0 : i32, i32
  }
}

</mosaic_0001>

<bundles_post_ra>
// kernel: mask2points_forward.1
= control target key start
LH: loop header
LB: loop body
LE: loop exit
PB: predicated region body
PF: predicated region fallthrough
CT: control target
= control target key end

     0   :  { %vm101_vm0 = vcmask 523264   ;;  %vm217_vm3 = vcmask 130048   ;;  %s417_s1 = inlined_call_operand.vmem [shape: bf16[64,256], index: 1, kind: input, shape index: {}]   ;;  %s418_s0 = inlined_call_operand.vmem [shape: bf16[2,16,64], index: 0, kind: input, shape index: {}]   ;;  %s419_s2 = inlined_call_operand.vmem [shape: f32[1,256], index: 2, kind: input, shape index: {}]   ;;  %s420_s3 = inlined_call_operand.vmem [shape: f32[1,256], index: 3, kind: input, shape index: {}]   ;;  %s421_s4 = inlined_call_operand.vmem [shape: bf16[16,128], index: 4, kind: input, shape index: {}]   ;;  %s422_s5 = inlined_call_operand.vmem [shape: f32[1,128], index: 5, kind: input, shape index: {}]   ;;  %s423_s6 = inlined_call_operand.vmem [shape: f32[2,128], index: 6, kind: output, shape index: {}]  }
   0x1   :  { %v275_v0 = vld [vmem:[%s417_s1 + $0x30] sm:$0xf]  ;;  %v299_v1 = vld [vmem:[%s417_s1 + $0x34] sm:$0xf0]  ;;  %v298_v2 = vld [vmem:[%s417_s1 + $0x34] sm:$0xf] }
   0x2   :  { %v276_v3 = vor.u32 %v299_v1, %v275_v0  ;;  %v277_v4 = vld [vmem:[%s417_s1 + $0x38] sm:$0xf0]  ;;  %v267_v5 = vld [vmem:[%s417_s1 + $0x20] sm:$0xf]  ;;  %v297_v6 = vld [vmem:[%s417_s1 + $0x24] sm:$0xf0] }
   0x3   :  { %v280_v7 = vor.u32 %v298_v2, %v277_v4  ;;  %v296_v8 = vld [vmem:[%s417_s1 + $0x24] sm:$0xf]  ;;  %v269_v9 = vld [vmem:[%s417_s1 + $0x28] sm:$0xf0]  ;;  %v268_v10 = vor.u32 %v297_v6, %v267_v5  ;;  %v259_v12 = vld [vmem:[%s417_s1 + $0x10] sm:$0xf]  ;;  %v180_v6 = vlaneseq }
   0x4   :  { %112 = vmatpush.bf16.msra.mxu0 %v276_v3  ;;  %301 = vmatpush.bf16.msra.mxu3 %v276_v3  ;;  %v272_v11 = vor.u32 %v296_v8, %v269_v9  ;;  %v295_v13 = vld [vmem:[%s417_s1 + $0x14] sm:$0xf0]  ;;  %v294_v14 = vld [vmem:[%s417_s1 + $0x14] sm:$0xf]  ;;  %v261_v15 = vld [vmem:[%s417_s1 + $0x18] sm:$0xf0] }
   0x5   :  { %131 = vmatpush.bf16.msra.mxu1 %v280_v7  ;;  %v260_v16 = vor.u32 %v295_v13, %v259_v12  ;;  %v264_v17 = vor.u32 %v294_v14, %v261_v15  ;;  %v251_v18 = vld [vmem:[%s417_s1] sm:$0xf]  ;;  %v293_v19 = vld [vmem:[%s417_s1 + $0x4] sm:$0xf0]  ;;  %v292_v20 = vld [vmem:[%s417_s1 + $0x4] sm:$0xf] }
   0x6   :  { %v253_v21 = vld [vmem:[%s417_s1 + $0x8] sm:$0xf0]  ;;  %v252_v22 = vor.u32 %v293_v19, %v251_v18  ;;  %v290_v24 = vld [vmem:[%s418_s0] sm:$0xff]  ;;  %v181_v8 = vand.u32 127, %v180_v6 }
   0x7   :  { %v256_v23 = vor.u32 %v292_v20, %v253_v21  ;;  %v291_v25 = vld [vmem:[%s418_s0 + $0x8] sm:$0xff]  ;;  %v45_v26 = vld [vmem:[%s419_s2] sm:$0x3] }
   0x8   :  { %113 = vmatpush.bf16.msra.mxu0 %v268_v10  ;;  %302 = vmatpush.bf16.msra.mxu3 %v268_v10  ;;  %v47_v27 = vperm.slane %v45_v26, 0  ;;  %v48_v28 = vperm.slane %v45_v26, 1  ;;  %v154_v29 = vld [vmem:[%s420_s3] sm:$0x3]  ;;  %vm187_vm1 = vcmp.eq.s32.totalorder %v181_v8, 1  ;;  %vm182_vm2 = vcmp.eq.s32.totalorder %v181_v8, 0 }
   0x9   :  { %132 = vmatpush.bf16.msra.mxu1 %v272_v11  ;;  %v156_v33 = vperm.slane %v154_v29, 0  ;;  %v157_v35 = vperm.slane %v154_v29, 1  ;;  %v300_v4 = vld [vmem:[%s421_s4] sm:$0xff] }
   0xa   :  { %228 = vmatpush.bf16.msra.mxu2 %v300_v4  ;;  %v306_v18 = vld [vmem:[%s422_s5] ss:$0 sm:$0xff] }
   0xb   :  { %32 = vst [vmem:[%s423_s6] sm:$0x3] %v306_v18 }
   0xc   :  { %114 = vmatpush.bf16.msra.mxu0 %v260_v16  ;;  %303 = vmatpush.bf16.msra.mxu3 %v260_v16 }
   0xd   :  { %133 = vmatpush.bf16.msra.mxu1 %v264_v17 }
  0x10   :  { %115 = vmatpush.bf16.msra.mxu0 %v252_v22  ;;  %304 = vmatpush.bf16.msra.mxu3 %v252_v22 }
  0x11   :  { %134 = vmatpush.bf16.msra.mxu1 %v256_v23 }
  0x12   :  { %v234_v20 = vld [vmem:[%s423_s6] sm:$0x3] }
  0x13   :  { %281 = vmatmul.msk.bf16.vlgmr.msra.gmra.mxu0 %vm101_vm0, %v290_v24  ;;  %282 = vmatmul.msk.bf16.vlgmr.msra.gmra.mxu3 %vm101_vm0, %v291_v25 }
  0x14   :  { %283 = vmatmul.msk.bf16.vlgmr.msra.gmra.mxu1 %vm101_vm0, %v290_v24 }
  0x24   :  { %284 = vmatmul.msk.bf16.gmra.mxu1 %vm101_vm0, %v291_v25 }
  0x90   :  { %v117_v30 = vpop.f32.mrf.mxu0 }
  0x91   :  { %v118_v31 = vadd.f32 %v117_v30, %v47_v27  ;;  %v136_v32 = vpop.f32.mrf.mxu1 }
  0x92   :  { %v137_v34 = vadd.f32 %v136_v32, %v48_v28 }
  0x93   :  { %v146_v36 = vmax.f32 %v118_v31, 0.0 }
  0x94   :  { %v147_v37 = vmax.f32 %v137_v34, 0.0 }
  0x95   :  { %v160_v38 = vmul.f32 %v156_v33, %v146_v36 }
  0x96   :  { %v161_v39 = vmul.f32 %v157_v35, %v147_v37  ;;  %v122_v43 = vpop.f32.mrf.mxu3 }
  0x97   :  { %v123_v47 = vadd.f32 %v122_v43, %v47_v27 }
  0x98   :  { %v119_v40 = vpop.f32.mrf.mxu0  ;;  %v168_v41 = vadd.f32 %v161_v39, %v160_v38 }
  0x99   :  { %v120_v42 = vadd.f32 %v119_v40, %v47_v27  ;;  %v138_v44 = vpop.f32.mrf.mxu1  ;;  %v150_v51 = vmax.f32 %v123_v47, 0.0 }
  0x9a   :  { %v139_v45 = vadd.f32 %v138_v44, %v48_v28  ;;  %169 = vadd.xlane.f32.xlu0 %v168_v41 }
  0x9b   :  { %v148_v46 = vmax.f32 %v120_v42, 0.0  ;;  %v164_v57 = vmul.f32 %v156_v33, %v150_v51 }
  0x9c   :  { %v149_v48 = vmax.f32 %v139_v45, 0.0 }
  0x9d   :  { %v162_v49 = vmul.f32 %v156_v33, %v148_v46 }
  0x9e   :  { %v163_v50 = vmul.f32 %v157_v35, %v149_v48  ;;  %v124_v55 = vpop.f32.mrf.mxu3 }
  0x9f   :  { %v125_v58 = vadd.f32 %v124_v55, %v47_v27 }
  0xa0   :  { %v171_v52 = vadd.f32 %v163_v50, %v162_v49 }
  0xa1   :  { %v141_v53 = vpop.f32.mrf.mxu1  ;;  %v152_v62 = vmax.f32 %v125_v58, 0.0 }
  0xa2   :  { %v142_v54 = vadd.f32 %v141_v53, %v48_v28  ;;  %172 = vadd.xlane.f32.xlu0 %v171_v52 }
  0xa3   :  { %v166_v1 = vmul.f32 %v156_v33, %v152_v62 }
  0xa4   :  { %v151_v56 = vmax.f32 %v142_v54, 0.0 }
  0xa6   :  { %v165_v59 = vmul.f32 %v157_v35, %v151_v56 }
  0xa8   :  { %v174_v60 = vadd.f32 %v165_v59, %v164_v57 }
  0xa9   :  { %v143_v61 = vpop.f32.mrf.mxu1 }
  0xaa   :  { %v144_v63 = vadd.f32 %v143_v61, %v48_v28  ;;  %175 = vadd.xlane.f32.xlu1 %v174_v60 }
  0xac   :  { %v153_v0 = vmax.f32 %v144_v63, 0.0 }
  0xae   :  { %v167_v2 = vmul.f32 %v157_v35, %v153_v0 }
  0xb0   :  { %v177_v3 = vadd.f32 %v167_v2, %v166_v1 }
  0xb2   :  { %178 = vadd.xlane.f32.xlu1 %v177_v3 }
 0x10d   :  { %v170_v5 = vpop.xlane.xlu0 %169 }
 0x10e   :  { %v183_v12 = vsel %vm182_vm2, %v170_v5, 0.0 }
 0x115   :  { %v173_v9 = vpop.xlane.xlu0 %172 }
 0x116   :  { %v184_v13 = vsel %vm182_vm2, %v173_v9, 0.0 }
 0x11d   :  { %v176_v7 = vpop.xlane.xlu1 %175 }
 0x11e   :  { %v188_v10 = vsel %vm187_vm1, %v176_v7, 0.0 }
 0x11f   :  { %v190_v15 = vadd.f32 %v188_v10, %v183_v12 }
 0x125   :  { %v179_v11 = vpop.xlane.xlu1 %178 }
 0x126   :  { %v189_v14 = vsel %vm187_vm1, %v179_v11, 0.0 }
 0x127   :  { %v191_v16 = vadd.f32 %v189_v14, %v184_v13 }
 0x129   :  { %v192_v17 = vpack.c.bf16 %v191_v16, %v190_v15 }
 0x12b   :  { %195 = vxpose.xlu2.c.b16.start.end [1/1] (short) (narrow) %v192_v17, 16 }
 0x1cc   :  { %v203_v19 = vpop.trf.xlu2 }
 0x1cd   :  { %289 = vmatmul.msk.bf16.vlgmr.msra.gmra.mxu2 %vm217_vm3, %v203_v19 }
 0x250   :  { %v230_v21 = vpop.f32.mrf.mxu2 }
 0x251   :  { %v235_v22 = vadd.f32 %v234_v20, %v230_v21 }
 0x253   :  { %236 = vst [vmem:[%s423_s6] sm:$0x3] %v235_v22 }
 0x258   :  { %v232_v23 = vpop.f32.mrf.mxu2 }

</bundles_post_ra>
